<compile_context>
chip_gen: v7x
topology: tpu7x:2x2x1
jax: 0.10.0
libtpu: 0.0.40
codegen_flags: <defaults>
</compile_context>

<pallas_src>
import functools

import jax
import jax.numpy as jnp
from jax.experimental import pallas as pl
from jax.experimental.pallas import tpu as pltpu

LOG_STD_MAX = 2.0
LOG_STD_MIN = -5.0
HEAD_PAD = 128  # lane-dense width of the fused head output slab


def _round_up(n, m):
    return ((n + m - 1) // m) * m


def actor_critic_kernel(
    x_ref,
    w1_ref, b1_ref,
    w2_ref, b2_ref,
    wh_ref, bh_ref,
    out_ref,
    *, act_dim,
):
    # shared_layer: Linear -> tanh -> Linear -> tanh
    # bf16 matmul operands, f32 accumulation and f32 elementwise (v5e-safe).
    h1 = jnp.tanh(
        jnp.dot(x_ref[...], w1_ref[...], preferred_element_type=jnp.float32)
        + b1_ref[...]
    )
    h2 = jnp.tanh(
        jnp.dot(h1.astype(w2_ref.dtype), w2_ref[...],
                preferred_element_type=jnp.float32)
        + b2_ref[...]
    )

    # fused heads: columns are [mean | logstd | value | zero-pad] -> [TB, 128]
    heads = (
        jnp.dot(h2.astype(wh_ref.dtype), wh_ref[...],
                preferred_element_type=jnp.float32)
        + bh_ref[...]
    )

    # tanh + rescale applied only to the logstd column slice (column mask keeps
    # the output slab lane-dense; tanh runs on the EUP slot, where is VPU).
    col = jax.lax.broadcasted_iota(jnp.int32, heads.shape, 1)
    is_logstd = jnp.logical_and(col >= act_dim, col < 2 * act_dim)
    ls = LOG_STD_MIN + 0.5 * (LOG_STD_MAX - LOG_STD_MIN) * (jnp.tanh(heads) + 1.0)

    out_ref[...] = jnp.where(is_logstd, ls, heads)


def actor_critic_forward(x, params, *, tb=128):
    """Run the ActorCritic forward pass as one batch-gridded Pallas kernel.

    x: [B, obs_dim] float32
    params: dict of per-layer weights/biases (see init_params).
    Returns (mean [B, act_dim], log_std [B, act_dim], value [B, 1]), float32.
    """
    B, obs_dim = x.shape
    hidden = params["w1"].shape[1]
    act_dim = params["wm"].shape[1]
    head_dim = 2 * act_dim + 1
    assert head_dim <= HEAD_PAD, "action dim too large for fused head pad"

    # --- fuse + pad the three heads into one lane-dense [hidden, 128] weight ---
    wh = jnp.concatenate([params["wm"], params["wl"], params["wc"]], axis=1)
    wh = jnp.pad(wh, ((0, 0), (0, HEAD_PAD - head_dim)))
    bh = jnp.concatenate([params["bm"], params["bl"], params["bc"]], axis=1)
    bh = jnp.pad(bh, ((0, 0), (0, HEAD_PAD - head_dim)))

    # bf16 matmul operands; biases stay f32.
    w1 = params["w1"].astype(jnp.bfloat16)
    w2 = params["w2"].astype(jnp.bfloat16)
    wh = wh.astype(jnp.bfloat16)
    b1 = params["b1"].astype(jnp.float32)
    b2 = params["b2"].astype(jnp.float32)
    bh = bh.astype(jnp.float32)

    # --- batch tiling (tile capped so double-buffered tiles fit v7x VMEM) ---
    tb = min(tb, _round_up(B, 8))
    Bp = _round_up(B, tb)
    xb = x.astype(jnp.bfloat16)
    if Bp != B:
        xb = jnp.pad(xb, ((0, Bp - B), (0, 0)))
    grid = (Bp // tb,)

    resident = lambda i: (0, 0)  # weights/biases stay VMEM-resident
    in_specs = [
        pl.BlockSpec((tb, obs_dim), lambda i: (i, 0)),       # x tile over batch
        pl.BlockSpec((obs_dim, hidden), resident),           # w1
        pl.BlockSpec((1, hidden), resident),                 # b1
        pl.BlockSpec((hidden, hidden), resident),            # w2
        pl.BlockSpec((1, hidden), resident),                 # b2
        pl.BlockSpec((hidden, HEAD_PAD), resident),          # fused head weight
        pl.BlockSpec((1, HEAD_PAD), resident),               # fused head bias
    ]
    out_specs = pl.BlockSpec((tb, HEAD_PAD), lambda i: (i, 0))

    flops = 2 * Bp * (obs_dim * hidden + hidden * hidden + hidden * HEAD_PAD)
    transcendentals = Bp * (2 * hidden + HEAD_PAD)
    bytes_accessed = (
        xb.size * 2
        + (w1.size + w2.size + wh.size) * 2
        + (b1.size + b2.size + bh.size) * 4
        + Bp * HEAD_PAD * 4
    )

    out = pl.pallas_call(
        functools.partial(actor_critic_kernel, act_dim=act_dim),
        out_shape=jax.ShapeDtypeStruct((Bp, HEAD_PAD), jnp.float32),
        grid=grid,
        in_specs=in_specs,
        out_specs=out_specs,
        compiler_params=pltpu.CompilerParams(
            dimension_semantics=("parallel",),
        ),
        cost_estimate=pl.CostEstimate(
            flops=flops,
            transcendentals=transcendentals,
            bytes_accessed=bytes_accessed,
        ),
    )(xb, w1, b1, w2, b2, wh, bh)

    out = out[:B]
    mean = out[:, :act_dim]
    log_std = out[:, act_dim:2 * act_dim]
    value = out[:, 2 * act_dim:2 * act_dim + 1]
    return mean, log_std, value


def _linear_init(key, fan_in, fan_out):
    """Deterministic init mimicking nn.Linear default (uniform +/- 1/sqrt(fan_in))."""
    kw, kb = jax.random.split(key)
    bound = 1.0 / jnp.sqrt(jnp.float32(fan_in))
    w = jax.random.uniform(kw, (fan_in, fan_out), jnp.float32, -bound, bound)
    b = jax.random.uniform(kb, (1, fan_out), jnp.float32, -bound, bound)
    return w, b


def init_params(key, obs_dim, hidden_dim, act_dim):
    keys = jax.random.split(key, 5)
    w1, b1 = _linear_init(keys[0], obs_dim, hidden_dim)
    w2, b2 = _linear_init(keys[1], hidden_dim, hidden_dim)
    wm, bm = _linear_init(keys[2], hidden_dim, act_dim)
    wl, bl = _linear_init(keys[3], hidden_dim, act_dim)
    wc, bc = _linear_init(keys[4], hidden_dim, 1)
    return dict(
        w1=w1, b1=b1, w2=w2, b2=b2,
        wm=wm, bm=bm, wl=wl, bl=bl, wc=wc, bc=bc,
    )


def reference_forward(x, p, *, bf16_inputs=False):
    """Pure-JAX reference mirroring the PyTorch module.

    With bf16_inputs=True the matmul operands are rounded to bf16 (matching the
    kernel's operand precision) so the comparison isolates kernel bugs from
    expected bf16 quantization.
    """
    def cast(a):
        return a.astype(jnp.bfloat16).astype(jnp.float32) if bf16_inputs else a

    xr = cast(x)
    h1 = jnp.tanh(xr @ cast(p["w1"]) + p["b1"])
    h2 = jnp.tanh(cast(h1) @ cast(p["w2"]) + p["b2"])
    h2c = cast(h2)
    mean = h2c @ cast(p["wm"]) + p["bm"]
    ls = jnp.tanh(h2c @ cast(p["wl"]) + p["bl"])
    log_std = LOG_STD_MIN + 0.5 * (LOG_STD_MAX - LOG_STD_MIN) * (ls + 1.0)
    value = h2c @ cast(p["wc"]) + p["bc"]
    return mean, log_std, value


if __name__ == "__main__":
    # Small shapes consistent with the module: Box action space with 2 dims,
    # obs_dim=16, hidden_dim=64 (module default), batch=256 (two grid tiles).
    B, OBS_DIM, HIDDEN_DIM, ACT_DIM = 256, 16, 64, 2

    key = jax.random.PRNGKey(0)
    kx, kp = jax.random.split(key)
    x = jax.random.normal(kx, (B, OBS_DIM), jnp.float32)
    params = init_params(kp, OBS_DIM, HIDDEN_DIM, ACT_DIM)

    # Jit the whole wrapper so head concat/pad + casts fuse with the kernel call.
    forward = jax.jit(functools.partial(actor_critic_forward, tb=128))

    mean, log_std, value = forward(x, params)
    jax.block_until_ready((mean, log_std, value))

    assert mean.shape == (B, ACT_DIM)
    assert log_std.shape == (B, ACT_DIM)
    assert value.shape == (B, 1)

    # Tight check against a reference using the same bf16 matmul operands.
    m_b, l_b, v_b = reference_forward(x, params, bf16_inputs=True)
    assert jnp.allclose(mean, m_b, atol=5e-3), float(jnp.max(jnp.abs(mean - m_b)))
    assert jnp.allclose(log_std, l_b, atol=5e-3), float(jnp.max(jnp.abs(log_std - l_b)))
    assert jnp.allclose(value, v_b, atol=5e-3), float(jnp.max(jnp.abs(value - v_b)))

    # Loose check against the full-f32 reference (expected bf16 quantization noise).
    m_f, l_f, v_f = reference_forward(x, params, bf16_inputs=False)
    assert jnp.allclose(mean, m_f, atol=1.5e-1)
    assert jnp.allclose(log_std, l_f, atol=1.5e-1)
    assert jnp.allclose(value, v_f, atol=1.5e-1)

    print("KERNEL_OK")
</pallas_src>

<mosaic_0001>
module attributes {stable_mosaic.version = 11 : i64} {
  func.func @actor_critic_kernel(%arg0: i32, %arg1: memref<128x16xbf16, #tpu.memory_space<vmem>>, %arg2: memref<16x64xbf16, #tpu.memory_space<vmem>>, %arg3: memref<1x64xf32, #tpu.memory_space<vmem>>, %arg4: memref<64x64xbf16, #tpu.memory_space<vmem>>, %arg5: memref<1x64xf32, #tpu.memory_space<vmem>>, %arg6: memref<64x128xbf16, #tpu.memory_space<vmem>>, %arg7: memref<1x128xf32, #tpu.memory_space<vmem>>, %arg8: memref<128x128xf32, #tpu.memory_space<vmem>>) attributes {dimension_semantics = [#tpu.dimension_semantics<parallel>], iteration_bounds = array<i64: 2>, scalar_prefetch = 0 : i64, scratch_operands = 0 : i64, tpu.core_type = #tpu.core_type<tc>, window_params = [{transform_indices = @transform_0, window_bounds = array<i64: 128, 16>}, {pipeline_mode = #tpu.pipeline_mode<synchronous>, transform_indices = @transform_1, window_bounds = array<i64: 16, 64>}, {pipeline_mode = #tpu.pipeline_mode<synchronous>, transform_indices = @transform_2, window_bounds = array<i64: 1, 64>}, {pipeline_mode = #tpu.pipeline_mode<synchronous>, transform_indices = @transform_3, window_bounds = array<i64: 64, 64>}, {pipeline_mode = #tpu.pipeline_mode<synchronous>, transform_indices = @transform_4, window_bounds = array<i64: 1, 64>}, {pipeline_mode = #tpu.pipeline_mode<synchronous>, transform_indices = @transform_5, window_bounds = array<i64: 64, 128>}, {pipeline_mode = #tpu.pipeline_mode<synchronous>, transform_indices = @transform_6, window_bounds = array<i64: 1, 128>}, {transform_indices = @transform_7, window_bounds = array<i64: 128, 128>}]} {
    %c0 = arith.constant 0 : index
    %c0_0 = arith.constant 0 : index
    %0 = vector.load %arg1[%c0, %c0_0] : memref<128x16xbf16, #tpu.memory_space<vmem>>, vector<128x16xbf16>
    %c0_1 = arith.constant 0 : index
    %c0_2 = arith.constant 0 : index
    %1 = vector.load %arg2[%c0_1, %c0_2] : memref<16x64xbf16, #tpu.memory_space<vmem>>, vector<16x64xbf16>
    %cst = arith.constant dense<0.000000e+00> : vector<128x64xf32>
    %2 = tpu.matmul %0, %1, %cst {dimension_numbers = #tpu.dot_dimension_numbers<[1], [0], [0], [1], [0, 0, 1, 1], [], []>} : vector<128x16xbf16>, vector<16x64xbf16>, vector<128x64xf32> -> vector<128x64xf32>
    %c0_3 = arith.constant 0 : index
    %c0_4 = arith.constant 0 : index
    %3 = vector.load %arg3[%c0_3, %c0_4] : memref<1x64xf32, #tpu.memory_space<vmem>>, vector<1x64xf32>
    %4 = vector.broadcast %3 : vector<1x64xf32> to vector<128x64xf32>
    %5 = arith.addf %2, %4 : vector<128x64xf32>
    %6 = math.tanh %5 : vector<128x64xf32>
    %7 = arith.truncf %6 : vector<128x64xf32> to vector<128x64xbf16>
    %c0_5 = arith.constant 0 : index
    %c0_6 = arith.constant 0 : index
    %8 = vector.load %arg4[%c0_5, %c0_6] : memref<64x64xbf16, #tpu.memory_space<vmem>>, vector<64x64xbf16>
    %cst_7 = arith.constant dense<0.000000e+00> : vector<128x64xf32>
    %9 = tpu.matmul %7, %8, %cst_7 {dimension_numbers = #tpu.dot_dimension_numbers<[1], [0], [0], [1], [0, 0, 1, 1], [], []>} : vector<128x64xbf16>, vector<64x64xbf16>, vector<128x64xf32> -> vector<128x64xf32>
    %c0_8 = arith.constant 0 : index
    %c0_9 = arith.constant 0 : index
    %10 = vector.load %arg5[%c0_8, %c0_9] : memref<1x64xf32, #tpu.memory_space<vmem>>, vector<1x64xf32>
    %11 = vector.broadcast %10 : vector<1x64xf32> to vector<128x64xf32>
    %12 = arith.addf %9, %11 : vector<128x64xf32>
    %13 = math.tanh %12 : vector<128x64xf32>
    %14 = arith.truncf %13 : vector<128x64xf32> to vector<128x64xbf16>
    %c0_10 = arith.constant 0 : index
    %c0_11 = arith.constant 0 : index
    %15 = vector.load %arg6[%c0_10, %c0_11] : memref<64x128xbf16, #tpu.memory_space<vmem>>, vector<64x128xbf16>
    %cst_12 = arith.constant dense<0.000000e+00> : vector<128x128xf32>
    %16 = tpu.matmul %14, %15, %cst_12 {dimension_numbers = #tpu.dot_dimension_numbers<[1], [0], [0], [1], [0, 0, 1, 1], [], []>} : vector<128x64xbf16>, vector<64x128xbf16>, vector<128x128xf32> -> vector<128x128xf32>
    %c0_13 = arith.constant 0 : index
    %c0_14 = arith.constant 0 : index
    %17 = vector.load %arg7[%c0_13, %c0_14] : memref<1x128xf32, #tpu.memory_space<vmem>>, vector<1x128xf32>
    %18 = vector.broadcast %17 : vector<1x128xf32> to vector<128x128xf32>
    %19 = arith.addf %16, %18 : vector<128x128xf32>
    %20 = tpu.iota {dimensions = array<i32: 1>} : vector<128x128xi32>
    %c2_i32 = arith.constant 2 : i32
    %21 = vector.broadcast %c2_i32 : i32 to vector<128x128xi32>
    %22 = arith.cmpi sge, %20, %21 : vector<128x128xi32>
    %c4_i32 = arith.constant 4 : i32
    %23 = vector.broadcast %c4_i32 : i32 to vector<128x128xi32>
    %24 = arith.cmpi slt, %20, %23 : vector<128x128xi32>
    %25 = arith.andi %22, %24 : vector<128x128xi1>
    %26 = math.tanh %19 : vector<128x128xf32>
    %cst_15 = arith.constant 1.000000e+00 : f32
    %27 = vector.broadcast %cst_15 : f32 to vector<128x128xf32>
    %28 = arith.addf %26, %27 : vector<128x128xf32>
    %cst_16 = arith.constant 3.500000e+00 : f32
    %29 = vector.broadcast %cst_16 : f32 to vector<128x128xf32>
    %30 = arith.mulf %29, %28 : vector<128x128xf32>
    %cst_17 = arith.constant -5.000000e+00 : f32
    %31 = vector.broadcast %cst_17 : f32 to vector<128x128xf32>
    %32 = arith.addf %31, %30 : vector<128x128xf32>
    %33 = arith.select %25, %32, %19 : vector<128x128xi1>, vector<128x128xf32>
    %c0_18 = arith.constant 0 : index
    %c0_19 = arith.constant 0 : index
    %34 = vector.load %arg8[%c0_18, %c0_19] : memref<128x128xf32, #tpu.memory_space<vmem>>, vector<128x128xf32>
    tpu.vector_store %arg8[%c0_18, %c0_19], %33 {strides = array<i32>} : memref<128x128xf32, #tpu.memory_space<vmem>>, vector<128x128xf32>,
    return
  }
  func.func @transform_0(%arg0: i32) -> (i32, i32) {
    %c0_i32 = arith.constant 0 : i32
    %c0_i32_0 = arith.constant 0 : i32
    return %arg0, %c0_i32 : i32, i32
  }
  func.func @transform_1(%arg0: i32) -> (i32, i32) {
    %c0_i32 = arith.constant 0 : i32
    %c0_i32_0 = arith.constant 0 : i32
    %c0_i32_1 = arith.constant 0 : i32
    return %c0_i32, %c0_i32_0 : i32, i32
  }
  func.func @transform_2(%arg0: i32) -> (i32, i32) {
    %c0_i32 = arith.constant 0 : i32
    %c0_i32_0 = arith.constant 0 : i32
    %c0_i32_1 = arith.constant 0 : i32
    return %c0_i32, %c0_i32_0 : i32, i32
  }
  func.func @transform_3(%arg0: i32) -> (i32, i32) {
    %c0_i32 = arith.constant 0 : i32
    %c0_i32_0 = arith.constant 0 : i32
    %c0_i32_1 = arith.constant 0 : i32
    return %c0_i32, %c0_i32_0 : i32, i32
  }
  func.func @transform_4(%arg0: i32) -> (i32, i32) {
    %c0_i32 = arith.constant 0 : i32
    %c0_i32_0 = arith.constant 0 : i32
    %c0_i32_1 = arith.constant 0 : i32
    return %c0_i32, %c0_i32_0 : i32, i32
  }
  func.func @transform_5(%arg0: i32) -> (i32, i32) {
    %c0_i32 = arith.constant 0 : i32
    %c0_i32_0 = arith.constant 0 : i32
    %c0_i32_1 = arith.constant 0 : i32
    return %c0_i32, %c0_i32_0 : i32, i32
  }
  func.func @transform_6(%arg0: i32) -> (i32, i32) {
    %c0_i32 = arith.constant 0 : i32
    %c0_i32_0 = arith.constant 0 : i32
    %c0_i32_1 = arith.constant 0 : i32
    return %c0_i32, %c0_i32_0 : i32, i32
  }
  func.func @transform_7(%arg0: i32) -> (i32, i32) {
    %c0_i32 = arith.constant 0 : i32
    %c0_i32_0 = arith.constant 0 : i32
    return %arg0, %c0_i32 : i32, i32
  }
}

</mosaic_0001>

<bundles_post_ra>
// kernel: actor_critic_forward.1
= control target key start
LH: loop header
LB: loop body
LE: loop exit
PB: predicated region body
PF: predicated region fallthrough
CT: control target
= control target key end

     0   :  { %s1327_s24 = smov 0   ;;  %s1524_s0 = inlined_call_operand.vmem [shape: bf16[256,16], index: 0, kind: input, shape index: {}]   ;;  %s1525_s1 = inlined_call_operand.vmem [shape: bf16[16,64], index: 1, kind: input, shape index: {}]   ;;  %s1526_s2 = inlined_call_operand.vmem [shape: f32[1,64], index: 2, kind: input, shape index: {}]   ;;  %s1527_s3 = inlined_call_operand.vmem [shape: bf16[64,64], index: 3, kind: input, shape index: {}]   ;;  %s1528_s4 = inlined_call_operand.vmem [shape: f32[1,64], index: 4, kind: input, shape index: {}]   ;;  %s1529_s5 = inlined_call_operand.vmem [shape: bf16[64,128], index: 5, kind: input, shape index: {}]   ;;  %s1530_s6 = inlined_call_operand.vmem [shape: f32[1,128], index: 6, kind: input, shape index: {}]   ;;  %s1531_s7 = inlined_call_operand.vmem [shape: f32[256,128], index: 7, kind: output, shape index: {}]  }
   0x1 LB: > { %s1002_s25 = sadd.s32 4294967295, %s1285_s24   ;;  %p1006_p0 = scmp.ge.s32.totalorder %s1285_s24, 1  ;;  %s1285_s24 = sphi %s1327_s24, %s17_s24  }
   0x2   : > { %p238_p1 = scmp.lt.s32.totalorder %s1285_s24, 3 }
   0x4   : > { %p239_p2 = pnand %p1006_p0, %p238_p1 }
   0x5   : > { %v1166_v0 = vld [vmem:[%s1525_s1] sm:$0xff] (!%p239_p2)   ;;  %s1007_s28 = sshll.u32 (!%p239_p2), %s1002_s25, 4  ;;  %vm354_vm0 = vcmask (!%p239_p2), 130048   ;;  %v1176_v10 = vld [vmem:[%s1527_s3 + $0x8] sm:$0xff] (!%p239_p2)   ;;  %v1177_v11 = vld [vmem:[%s1527_s3 + $0x10] sm:$0xff] (!%p239_p2)   ;;  %vm539_vm1 = vcmask (!%p239_p2), 523264  }
   0x6   : > { %242 = sbr.rel (%p239_p2) target bundleno = 740 (0x2e4), region = 48  ;;  %p271_p3 = scmp.lt.s32.totalorder (!%p239_p2), %s1007_s28, 31  ;;  %1090 = vmatprep.subr.bf16.mxu0 (!%p239_p2), %v1166_v0  ;;  %1156 = vmatprep.subr.bf16.mxu1 (!%p239_p2), %v1166_v0  ;;  %v1175_v9 = vld [vmem:[%s1527_s3] sm:$0xff] (!%p239_p2)   ;;  %v1178_v12 = vld [vmem:[%s1527_s3 + $0x18] sm:$0xff] (!%p239_p2)  }
   0x7   : > { %1091 = vmatpush3.bf16.msra.mxu0 (!%p239_p2), %v1166_v0  ;;  %1157 = vmatpush3.bf16.msra.mxu1 (!%p239_p2), %v1166_v0  ;;  %v1011_v13 = vld [vmem:[%s1526_s2] ss:$0 sm:$0xff] (!%p239_p2) }
   0x8   : > { %1108 = vmatprep.subr.bf16.mxu1 (!%p239_p2), %v1175_v9 }
   0xd   : > { %s1535_s28 = smov (!%p271_p3, %s1007_s28), 31 }
   0xe   : > { %s1008_s29 = sshll.u32 %s1535_s28, 2  ;;  %s1010_s11 = sshll.u32 %s1535_s28, 3 }
   0xf   : > { %s274_s9 = scalar_lea.vmem %s1524_s0, %s1008_s29  ;;  %s1437_s14 = scalar_lea.vmem %s1531_s7, %s1010_s11 }
  0x10   : > { %v1167_v1 = vld [vmem:[%s274_s9] sm:$0xff]   ;;  %v1168_v2 = vld [vmem:[%s274_s9 + $0x8] sm:$0xff]   ;;  %v1169_v3 = vld [vmem:[%s274_s9 + $0x10] sm:$0xff]  }
  0x11   : > { %1092 = vmatprep.mubr.msk.bf16.mxu0 %vm354_vm0, %v1167_v1  ;;  %v1171_v4 = vld [vmem:[%s274_s9 + $0x20] sm:$0xff]   ;;  %v1172_v5 = vld [vmem:[%s274_s9 + $0x28] sm:$0xff]   ;;  %v1173_v6 = vld [vmem:[%s274_s9 + $0x30] sm:$0xff]  }
  0x12   : > { %1093 = vmatmul.mubr.msk.bf16.vlgmr.msra.gmra.mrb[0].mxu0 %vm354_vm0, %v1168_v2  ;;  %1100 = vmatprep.mubr.msk.bf16.mxu1 %vm354_vm0, %v1171_v4  ;;  %v1170_v7 = vld [vmem:[%s274_s9 + $0x18] sm:$0xff]  }
  0x13   : > { %1096 = vmatprep.mubr.msk.bf16.mxu0 %vm354_vm0, %v1169_v3  ;;  %1101 = vmatmul.mubr.msk.bf16.vlgmr.msra.gmra.mrb[0].mxu1 %vm354_vm0, %v1172_v5  ;;  %v1174_v8 = vld [vmem:[%s274_s9 + $0x38] sm:$0xff]  }
  0x14   : > { %1104 = vmatprep.mubr.msk.bf16.mxu1 %vm354_vm0, %v1173_v6  ;;  %1109 = vmatpush3.bf16.msra.mxu1 %v1175_v9  ;;  %v1179_v6 = vld [vmem:[%s1529_s5] sm:$0xff]   ;;  %v1182_v9 = vld [vmem:[%s1529_s5 + $0x18] sm:$0xff]  }
  0x15   : > { %1110 = vmatprep.subr.bf16.mxu1 %v1176_v10  ;;  %1132 = vmatprep.subr.bf16.mxu0 %v1179_v6 }
  0x16   : > { %1133 = vmatpush3.bf16.msra.mxu0 %v1179_v6 }
  0x18   : > { %1111 = vmatpush3.bf16.msra.mxu1 %v1176_v10  ;;  %v1029_v10 = vld [vmem:[%s1528_s4] ss:$0 sm:$0xff] }
  0x19   : > { %1112 = vmatprep.subr.bf16.mxu1 %v1177_v11 }
  0x1a   : > { %1097 = vmatmul.mubr.msk.bf16.gmra.mrb[4].mxu0 %vm354_vm0, %v1170_v7  ;;  %v1180_v7 = vld [vmem:[%s1529_s5 + $0x8] sm:$0xff]  }
  0x1b   : > { %1105 = vmatmul.mubr.msk.bf16.gmra.mrb[4].mxu1 %vm354_vm0, %v1174_v8  ;;  %1134 = vmatprep.subr.bf16.mxu0 %v1180_v7  ;;  %v1181_v8 = vld [vmem:[%s1529_s5 + $0x10] sm:$0xff]  }
  0x1c   : > { %1113 = vmatpush3.bf16.msra.mxu1 %v1177_v11  ;;  %1135 = vmatpush3.bf16.msra.mxu0 %v1180_v7 }
  0x1d   : > { %1114 = vmatprep.subr.bf16.mxu1 %v1178_v12  ;;  %1136 = vmatprep.subr.bf16.mxu0 %v1181_v8 }
  0x20   : > { %1115 = vmatpush3.bf16.msra.mxu1 %v1178_v12  ;;  %1137 = vmatpush3.bf16.msra.mxu0 %v1181_v8 }
  0x21   : > { %1138 = vmatprep.subr.bf16.mxu0 %v1182_v9 }
  0x24   : > { %1139 = vmatpush3.bf16.msra.mxu0 %v1182_v9 }
  0xe5   : > { %v1094_v14 = vpop.f32.mrb[0].mxu0 }
  0xe6   : > { %v422_v15 = vadd.f32 %v1094_v14, %v1011_v13  ;;  %v413_v16 = vpop.f32.mrb[1].mxu0  ;;  %v1102_v22 = vpop.f32.mrb[0].mxu1 }
  0xe7   : > { %v414_v17 = vadd.f32 %v1011_v13, %v413_v16  ;;  %v1095_v18 = vpop.f32.mrb[2].mxu0  ;;  %v454_v23 = vadd.f32 %v1102_v22, %v1011_v13  ;;  %v445_v24 = vpop.f32.mrb[1].mxu1 }
  0xe8   : > { %1183 = vtanh.f32 %v422_v15  ;;  %v425_v19 = vadd.f32 %v1095_v18, %v1011_v13  ;;  %v416_v20 = vpop.f32.mrb[3].mxu0  ;;  %v446_v25 = vadd.f32 %v1011_v13, %v445_v24  ;;  %v1103_v26 = vpop.f32.mrb[2].mxu1 }
  0xe9   : > { %1185 = vtanh.f32 %v414_v17  ;;  %v417_v21 = vadd.f32 %v1011_v13, %v416_v20  ;;  %v457_v27 = vadd.f32 %v1103_v26, %v1011_v13  ;;  %v448_v28 = vpop.f32.mrb[3].mxu1 }
  0xea   : > { %1187 = vtanh.f32 %v425_v19  ;;  %v449_v30 = vadd.f32 %v1011_v13, %v448_v28 }
  0xeb   : > { %1189 = vtanh.f32 %v417_v21 }
  0xec   : > { %1191 = vtanh.f32 %v454_v23 }
  0xed   : > { %v1098_v29 = vpop.f32.mrb[4].mxu0  ;;  %1193 = vtanh.f32 %v446_v25 }
  0xee   : > { %v438_v31 = vadd.f32 %v1098_v29, %v1011_v13  ;;  %v429_v32 = vpop.f32.mrb[5].mxu0  ;;  %1195 = vtanh.f32 %v457_v27  ;;  %v1106_v38 = vpop.f32.mrb[4].mxu1 }
  0xef   : > { %v430_v33 = vadd.f32 %v1011_v13, %v429_v32  ;;  %v1099_v34 = vpop.f32.mrb[6].mxu0  ;;  %1197 = vtanh.f32 %v449_v30  ;;  %v470_v40 = vadd.f32 %v1106_v38, %v1011_v13  ;;  %v461_v41 = vpop.f32.mrb[5].mxu1 }
  0xf0   : > { %1199 = vtanh.f32 %v438_v31  ;;  %v441_v35 = vadd.f32 %v1099_v34, %v1011_v13  ;;  %v432_v36 = vpop.f32.mrb[7].mxu0  ;;  %v462_v43 = vadd.f32 %v1011_v13, %v461_v41  ;;  %v1107_v44 = vpop.f32.mrb[6].mxu1 }
  0xf1   : > { %1201 = vtanh.f32 %v430_v33  ;;  %v433_v37 = vadd.f32 %v1011_v13, %v432_v36  ;;  %v473_v46 = vadd.f32 %v1107_v44, %v1011_v13  ;;  %v464_v47 = vpop.f32.mrb[7].mxu1 }
  0xf2   : > { %v1184_v39 = vpop.eup %1183  ;;  %1203 = vtanh.f32 %v441_v35  ;;  %v465_v50 = vadd.f32 %v1011_v13, %v464_v47 }
  0xf3   : > { %v1186_v42 = vpop.eup %1185  ;;  %1205 = vtanh.f32 %v433_v37 }
  0xf4   : > { %v1188_v45 = vpop.eup %1187  ;;  %1207 = vtanh.f32 %v470_v40 }
  0xf5   : > { %v1190_v48 = vpop.eup %1189  ;;  %v493_v49 = vpack.c.bf16 %v1188_v45, %v1184_v39  ;;  %1209 = vtanh.f32 %v462_v43 }
  0xf6   : > { %v1192_v51 = vpop.eup %1191  ;;  %v492_v52 = vpack.c.bf16 %v1190_v48, %v1186_v42  ;;  %1211 = vtanh.f32 %v473_v46 }
  0xf7   : > { %v1194_v53 = vpop.eup %1193  ;;  %1213 = vtanh.f32 %v465_v50 }
  0xf8   : > { %v1196_v54 = vpop.eup %1195  ;;  %1116 = vmatprep.mubr.msk.bf16.mxu1 %vm539_vm1, %v492_v52 }
  0xf9   : > { %v1198_v55 = vpop.eup %1197  ;;  %1117 = vmatmul.mubr.msk.bf16.vlgmr.msra.gmra.mrb[8].mxu1 %vm539_vm1, %v493_v49  ;;  %v497_v56 = vpack.c.bf16 %v1196_v54, %v1192_v51 }
  0xfa   : > { %v1200_v57 = vpop.eup %1199  ;;  %v496_v58 = vpack.c.bf16 %v1198_v55, %v1194_v53 }
  0xfb   : > { %v1202_v59 = vpop.eup %1201 }
  0xfc   : > { %v1204_v60 = vpop.eup %1203 }
  0xfd   : > { %v1206_v61 = vpop.eup %1205  ;;  %v495_v62 = vpack.c.bf16 %v1204_v60, %v1200_v57 }
  0xfe   : > { %v1208_v63 = vpop.eup %1207  ;;  %v494_v0 = vpack.c.bf16 %v1206_v61, %v1202_v59 }
  0xff   : > { %v1210_v1 = vpop.eup %1209 }
 0x100   : > { %v1212_v2 = vpop.eup %1211  ;;  %1120 = vmatprep.mubr.msk.bf16.mxu1 %vm539_vm1, %v494_v0 }
 0x101   : > { %v1214_v3 = vpop.eup %1213  ;;  %1121 = vmatmul.mubr.msk.bf16.gmra.mrb[12].mxu1 %vm539_vm1, %v495_v62  ;;  %v499_v4 = vpack.c.bf16 %v1212_v2, %v1208_v63 }
 0x102   : > { %1124 = vmatprep.mubr.msk.bf16.mxu1 %vm539_vm1, %v496_v58  ;;  %v498_v5 = vpack.c.bf16 %v1214_v3, %v1210_v1  ;;  %v1401_v3 = vld [vmem:[%s1530_s6] ss:$0 sm:$0xff] }
 0x109   : > { %1125 = vmatmul.mubr.msk.bf16.gmra.mrb[16].mxu1 %vm539_vm1, %v497_v56 }
 0x10a   : > { %1128 = vmatprep.mubr.msk.bf16.mxu1 %vm539_vm1, %v498_v5 }
 0x111   : > { %1129 = vmatmul.mubr.msk.bf16.gmra.mrb[20].mxu1 %vm539_vm1, %v499_v4 }
 0x1cc   : > { %v1118_v11 = vpop.f32.mrb[8].mxu1 }
 0x1cd   : > { %v607_v12 = vadd.f32 %v1118_v11, %v1029_v10  ;;  %v598_v13 = vpop.f32.mrb[9].mxu1 }
 0x1ce   : > { %v599_v14 = vadd.f32 %v1029_v10, %v598_v13  ;;  %v1119_v15 = vpop.f32.mrb[10].mxu1 }
 0x1cf   : > { %1215 = vtanh.f32 %v607_v12  ;;  %v610_v16 = vadd.f32 %v1119_v15, %v1029_v10  ;;  %v601_v17 = vpop.f32.mrb[11].mxu1  ;;  %v845_v12 = vlaneseq }
 0x1d0   : > { %1217 = vtanh.f32 %v599_v14  ;;  %v602_v18 = vadd.f32 %v1029_v10, %v601_v17 }
 0x1d1   : > { %1219 = vtanh.f32 %v610_v16  ;;  %v846_v16 = vand.u32 127, %v845_v12 }
 0x1d2   : > { %1221 = vtanh.f32 %v602_v18 }
 0x1d3   : > { %vm847_vm2 = vcmp.ge.s32.totalorder %v846_v16, 2  ;;  %vm848_vm3 = vcmp.lt.s32.totalorder %v846_v16, 4 }
 0x1d4   : > { %v1122_v19 = vpop.f32.mrb[12].mxu1  ;;  %vm1427_vm4 = vmand %vm847_vm2, %vm848_vm3 }
 0x1d5   : > { %v623_v20 = vadd.f32 %v1122_v19, %v1029_v10  ;;  %v614_v21 = vpop.f32.mrb[13].mxu1 }
 0x1d6   : > { %v615_v22 = vadd.f32 %v1029_v10, %v614_v21  ;;  %v1123_v23 = vpop.f32.mrb[14].mxu1 }
 0x1d7   : > { %1223 = vtanh.f32 %v623_v20  ;;  %v626_v24 = vadd.f32 %v1123_v23, %v1029_v10  ;;  %v617_v25 = vpop.f32.mrb[15].mxu1 }
 0x1d8   : > { %1225 = vtanh.f32 %v615_v22  ;;  %v618_v26 = vadd.f32 %v1029_v10, %v617_v25 }
 0x1d9   : > { %v1216_v27 = vpop.eup %1215  ;;  %1227 = vtanh.f32 %v626_v24 }
 0x1da   : > { %v1218_v28 = vpop.eup %1217  ;;  %1229 = vtanh.f32 %v618_v26 }
 0x1db   : > { %v1220_v29 = vpop.eup %1219 }
 0x1dc   : > { %v1222_v30 = vpop.eup %1221  ;;  %v678_v31 = vpack.c.bf16 %v1220_v29, %v1216_v27  ;;  %v1126_v32 = vpop.f32.mrb[16].mxu1 }
 0x1dd   : > { %v639_v33 = vadd.f32 %v1126_v32, %v1029_v10  ;;  %v630_v34 = vpop.f32.mrb[17].mxu1  ;;  %v677_v35 = vpack.c.bf16 %v1222_v30, %v1218_v28 }
 0x1de   : > { %v631_v36 = vadd.f32 %v1029_v10, %v630_v34  ;;  %v1127_v37 = vpop.f32.mrb[18].mxu1 }
 0x1df   : > { %1231 = vtanh.f32 %v639_v33  ;;  %v642_v38 = vadd.f32 %v1127_v37, %v1029_v10  ;;  %v633_v39 = vpop.f32.mrb[19].mxu1  ;;  %1140 = vmatprep.mubr.msk.bf16.mxu0 %vm539_vm1, %v677_v35 }
 0x1e0   : > { %1233 = vtanh.f32 %v631_v36  ;;  %v634_v40 = vadd.f32 %v1029_v10, %v633_v39  ;;  %1141 = vmatmul.mubr.msk.bf16.vlgmr.msra.gmra.mrb[8].mxu0 %vm539_vm1, %v678_v31 }
 0x1e1   : > { %v1224_v41 = vpop.eup %1223  ;;  %1235 = vtanh.f32 %v642_v38 }
 0x1e2   : > { %v1226_v42 = vpop.eup %1225  ;;  %1237 = vtanh.f32 %v634_v40 }
 0x1e3   : > { %v1228_v43 = vpop.eup %1227 }
 0x1e4   : > { %v1230_v44 = vpop.eup %1229  ;;  %v1130_v45 = vpop.f32.mrb[20].mxu1  ;;  %v680_v46 = vpack.c.bf16 %v1228_v43, %v1224_v41 }
 0x1e5   : > { %v655_v47 = vadd.f32 %v1130_v45, %v1029_v10  ;;  %v646_v48 = vpop.f32.mrb[21].mxu1  ;;  %v679_v49 = vpack.c.bf16 %v1230_v44, %v1226_v42 }
 0x1e6   : > { %v647_v50 = vadd.f32 %v1029_v10, %v646_v48  ;;  %v1131_v51 = vpop.f32.mrb[22].mxu1 }
 0x1e7   : > { %1239 = vtanh.f32 %v655_v47  ;;  %v658_v52 = vadd.f32 %v1131_v51, %v1029_v10  ;;  %v649_v53 = vpop.f32.mrb[23].mxu1  ;;  %1144 = vmatprep.mubr.msk.bf16.mxu0 %vm539_vm1, %v679_v49 }
 0x1e8   : > { %1241 = vtanh.f32 %v647_v50  ;;  %v650_v54 = vadd.f32 %v1029_v10, %v649_v53  ;;  %1145 = vmatmul.mubr.msk.bf16.gmra.mrb[12].mxu0 %vm539_vm1, %v680_v46 }
 0x1e9   : > { %v1232_v55 = vpop.eup %1231  ;;  %1243 = vtanh.f32 %v658_v52 }
 0x1ea   : > { %v1234_v56 = vpop.eup %1233  ;;  %1245 = vtanh.f32 %v650_v54 }
 0x1eb   : > { %v1236_v57 = vpop.eup %1235 }
 0x1ec   : > { %v1238_v58 = vpop.eup %1237  ;;  %v682_v59 = vpack.c.bf16 %v1236_v57, %v1232_v55 }
 0x1ed   : > { %v681_v60 = vpack.c.bf16 %v1238_v58, %v1234_v56 }
 0x1ef   : > { %1148 = vmatprep.mubr.msk.bf16.mxu0 %vm539_vm1, %v681_v60 }
 0x1f0   : > { %1149 = vmatmul.mubr.msk.bf16.gmra.mrb[16].mxu0 %vm539_vm1, %v682_v59 }
 0x1f1   : > { %v1240_v61 = vpop.eup %1239 }
 0x1f2   : > { %v1242_v62 = vpop.eup %1241 }
 0x1f3   : > { %v1244_v63 = vpop.eup %1243 }
 0x1f4   : > { %v1246_v0 = vpop.eup %1245  ;;  %v684_v1 = vpack.c.bf16 %v1244_v63, %v1240_v61 }
 0x1f5   : > { %v683_v2 = vpack.c.bf16 %v1246_v0, %v1242_v62 }
 0x1f7   : > { %1152 = vmatprep.mubr.msk.bf16.mxu0 %vm539_vm1, %v683_v2 }
 0x1f8   : > { %1153 = vmatmul.mubr.msk.bf16.gmra.mrb[20].mxu0 %vm539_vm1, %v684_v1 }
 0x2b3   : > { %v1142_v4 = vpop.f32.mrb[8].mxu0 }
 0x2b4   : > { %v791_v5 = vadd.f32 %v1142_v4, %v1401_v3  ;;  %v782_v6 = vpop.f32.mrb[9].mxu0 }
 0x2b5   : > { %v783_v7 = vadd.f32 %v1401_v3, %v782_v6  ;;  %v1143_v8 = vpop.f32.mrb[10].mxu0 }
 0x2b6   : > { %1247 = vtanh.f32 %v791_v5  ;;  %v794_v9 = vadd.f32 %v1143_v8, %v1401_v3  ;;  %v785_v10 = vpop.f32.mrb[11].mxu0 }
 0x2b7   : > { %1249 = vtanh.f32 %v783_v7  ;;  %v1407_v11 = vadd.f32 %v1401_v3, %v785_v10 }
 0x2b8   : > { %1251 = vtanh.f32 %v794_v9 }
 0x2b9   : > { %1253 = vtanh.f32 %v1407_v11 }
 0x2bb   : > { %v1146_v13 = vpop.f32.mrb[12].mxu0 }
 0x2bc   : > { %v1411_v14 = vadd.f32 %v1146_v13, %v1401_v3  ;;  %v798_v15 = vpop.f32.mrb[13].mxu0 }
 0x2bd   : > { %v1414_v17 = vadd.f32 %v1401_v3, %v798_v15  ;;  %v1147_v18 = vpop.f32.mrb[14].mxu0 }
 0x2be   : > { %1255 = vtanh.f32 %v1411_v14  ;;  %v1418_v19 = vadd.f32 %v1147_v18, %v1401_v3  ;;  %v801_v20 = vpop.f32.mrb[15].mxu0 }
 0x2bf   : > { %1257 = vtanh.f32 %v1414_v17  ;;  %v1422_v21 = vadd.f32 %v1401_v3, %v801_v20 }
 0x2c0   : > { %v1248_v22 = vpop.eup %1247  ;;  %1259 = vtanh.f32 %v1418_v19 }
 0x2c1   : > { %v1250_v23 = vpop.eup %1249  ;;  %v868_v24 = vadd.f32 1.0, %v1248_v22  ;;  %1261 = vtanh.f32 %v1422_v21 }
 0x2c2   : > { %v1252_v25 = vpop.eup %1251  ;;  %v866_v26 = vadd.f32 1.0, %v1250_v23 }
 0x2c3   : > { %v1254_v27 = vpop.eup %1253  ;;  %v884_v28 = vmul.f32 3.5, %v868_v24  ;;  %v869_v29 = vadd.f32 1.0, %v1252_v25  ;;  %v1150_v30 = vpop.f32.mrb[16].mxu0 }
 0x2c4   : > { %v882_v32 = vmul.f32 3.5, %v866_v26  ;;  %v867_v33 = vadd.f32 1.0, %v1254_v27  ;;  %v1432_v34 = vadd.f32 %v1150_v30, %v1401_v3  ;;  %v814_v35 = vpop.f32.mrb[17].mxu0 }
 0x2c5   : > { %v900_v36 = vadd.f32 -5.0, %v884_v28  ;;  %v885_v37 = vmul.f32 3.5, %v869_v29  ;;  %v1440_v38 = vadd.f32 %v1401_v3, %v814_v35  ;;  %v1151_v39 = vpop.f32.mrb[18].mxu0 }
 0x2c6   : > { %v898_v40 = vadd.f32 -5.0, %v882_v32  ;;  %v883_v41 = vmul.f32 3.5, %v867_v33  ;;  %1263 = vtanh.f32 %v1432_v34  ;;  %v1444_v42 = vadd.f32 %v1151_v39, %v1401_v3  ;;  %v817_v43 = vpop.f32.mrb[19].mxu0 }
 0x2c7   : > { %v916_v44 = vsel %vm1427_vm4, %v900_v36, %v791_v5  ;;  %v901_v45 = vadd.f32 -5.0, %v885_v37  ;;  %1265 = vtanh.f32 %v1440_v38  ;;  %v1450_v46 = vadd.f32 %v1401_v3, %v817_v43 }
 0x2c8   : > { %v1256_v47 = vpop.eup %1255  ;;  %932 = vst [vmem:[%s1437_s14 + $0x10] sm:$0xff] %v916_v44  ;;  %v914_v48 = vsel %vm1427_vm4, %v898_v40, %v783_v7  ;;  %v899_v49 = vadd.f32 -5.0, %v883_v41  ;;  %1267 = vtanh.f32 %v1444_v42 }
 0x2c9   : > { %v1258_v50 = vpop.eup %1257  ;;  %930 = vst [vmem:[%s1437_s14] sm:$0xff] %v914_v48  ;;  %v917_v51 = vsel %vm1427_vm4, %v901_v45, %v794_v9  ;;  %v872_v52 = vadd.f32 1.0, %v1256_v47  ;;  %1269 = vtanh.f32 %v1450_v46 }
 0x2ca   : > { %v1260_v53 = vpop.eup %1259  ;;  %933 = vst [vmem:[%s1437_s14 + $0x18] sm:$0xff] %v917_v51  ;;  %v915_v54 = vsel %vm1427_vm4, %v899_v49, %v1407_v11  ;;  %v870_v55 = vadd.f32 1.0, %v1258_v50 }
 0x2cb   : > { %v1262_v56 = vpop.eup %1261  ;;  %931 = vst [vmem:[%s1437_s14 + $0x8] sm:$0xff] %v915_v54  ;;  %v888_v57 = vmul.f32 3.5, %v872_v52  ;;  %v873_v58 = vadd.f32 1.0, %v1260_v53  ;;  %v1154_v59 = vpop.f32.mrb[20].mxu0 }
 0x2cc   : > { %v886_v60 = vmul.f32 3.5, %v870_v55  ;;  %v871_v61 = vadd.f32 1.0, %v1262_v56  ;;  %v1466_v62 = vadd.f32 %v1154_v59, %v1401_v3  ;;  %v830_v63 = vpop.f32.mrb[21].mxu0 }
 0x2cd   : > { %v904_v0 = vadd.f32 -5.0, %v888_v57  ;;  %v889_v1 = vmul.f32 3.5, %v873_v58  ;;  %v1469_v2 = vadd.f32 %v1401_v3, %v830_v63  ;;  %v1155_v4 = vpop.f32.mrb[22].mxu0 }
 0x2ce   : > { %v902_v5 = vadd.f32 -5.0, %v886_v60  ;;  %v887_v6 = vmul.f32 3.5, %v871_v61  ;;  %1271 = vtanh.f32 %v1466_v62  ;;  %v842_v7 = vadd.f32 %v1155_v4, %v1401_v3  ;;  %v833_v8 = vpop.f32.mrb[23].mxu0 }
 0x2cf   : > { %v920_v9 = vsel %vm1427_vm4, %v904_v0, %v1411_v14  ;;  %v905_v10 = vadd.f32 -5.0, %v889_v1  ;;  %1273 = vtanh.f32 %v1469_v2  ;;  %v834_v11 = vadd.f32 %v1401_v3, %v833_v8 }
 0x2d0   : > { %v1264_v12 = vpop.eup %1263  ;;  %936 = vst [vmem:[%s1437_s14 + $0x30] sm:$0xff] %v920_v9  ;;  %v918_v13 = vsel %vm1427_vm4, %v902_v5, %v1414_v17  ;;  %v903_v15 = vadd.f32 -5.0, %v887_v6  ;;  %1275 = vtanh.f32 %v842_v7 }
 0x2d1   : > { %v1266_v16 = vpop.eup %1265  ;;  %934 = vst [vmem:[%s1437_s14 + $0x20] sm:$0xff] %v918_v13  ;;  %v921_v14 = vsel %vm1427_vm4, %v905_v10, %v1418_v19  ;;  %v876_v18 = vadd.f32 1.0, %v1264_v12  ;;  %1277 = vtanh.f32 %v834_v11 }
 0x2d2   : > { %v1268_v20 = vpop.eup %1267  ;;  %937 = vst [vmem:[%s1437_s14 + $0x38] sm:$0xff] %v921_v14  ;;  %v919_v3 = vsel %vm1427_vm4, %v903_v15, %v1422_v21  ;;  %v874_v22 = vadd.f32 1.0, %v1266_v16 }
 0x2d3   : > { %v1270_v23 = vpop.eup %1269  ;;  %935 = vst [vmem:[%s1437_s14 + $0x28] sm:$0xff] %v919_v3  ;;  %v892_v17 = vmul.f32 3.5, %v876_v18  ;;  %v877_v24 = vadd.f32 1.0, %v1268_v20 }
 0x2d4   : > { %v890_v25 = vmul.f32 3.5, %v874_v22  ;;  %v875_v26 = vadd.f32 1.0, %v1270_v23 }
 0x2d5   : > { %v908_v27 = vadd.f32 -5.0, %v892_v17  ;;  %v893_v19 = vmul.f32 3.5, %v877_v24 }
 0x2d6   : > { %v906_v28 = vadd.f32 -5.0, %v890_v25  ;;  %v891_v29 = vmul.f32 3.5, %v875_v26 }
 0x2d7   : > { %v924_v30 = vsel %vm1427_vm4, %v908_v27, %v1432_v34  ;;  %v909_v32 = vadd.f32 -5.0, %v893_v19 }
 0x2d8   : > { %v1272_v21 = vpop.eup %1271  ;;  %940 = vst [vmem:[%s1437_s14 + $0x50] sm:$0xff] %v924_v30  ;;  %v922_v33 = vsel %vm1427_vm4, %v906_v28, %v1440_v38  ;;  %v907_v35 = vadd.f32 -5.0, %v891_v29 }
 0x2d9   : > { %v1274_v36 = vpop.eup %1273  ;;  %938 = vst [vmem:[%s1437_s14 + $0x40] sm:$0xff] %v922_v33  ;;  %v925_v37 = vsel %vm1427_vm4, %v909_v32, %v1444_v42  ;;  %v880_v39 = vadd.f32 1.0, %v1272_v21 }
 0x2da   : > { %v1276_v40 = vpop.eup %1275  ;;  %941 = vst [vmem:[%s1437_s14 + $0x58] sm:$0xff] %v925_v37  ;;  %v923_v34 = vsel %vm1427_vm4, %v907_v35, %v1450_v46  ;;  %v878_v41 = vadd.f32 1.0, %v1274_v36 }
 0x2db   : > { %v1278_v43 = vpop.eup %1277  ;;  %939 = vst [vmem:[%s1437_s14 + $0x48] sm:$0xff] %v923_v34  ;;  %v896_v38 = vmul.f32 3.5, %v880_v39  ;;  %v881_v44 = vadd.f32 1.0, %v1276_v40 }
 0x2dc   : > { %v894_v45 = vmul.f32 3.5, %v878_v41  ;;  %v879_v47 = vadd.f32 1.0, %v1278_v43 }
 0x2dd   : > { %v912_v48 = vadd.f32 -5.0, %v896_v38  ;;  %v897_v42 = vmul.f32 3.5, %v881_v44 }
 0x2de   : > { %v910_v49 = vadd.f32 -5.0, %v894_v45  ;;  %v895_v50 = vmul.f32 3.5, %v879_v47 }
 0x2df   : > { %v928_v51 = vsel %vm1427_vm4, %v912_v48, %v1466_v62  ;;  %v913_v52 = vadd.f32 -5.0, %v897_v42 }
 0x2e0   : > { %944 = vst [vmem:[%s1437_s14 + $0x70] sm:$0xff] %v928_v51  ;;  %v926_v46 = vsel %vm1427_vm4, %v910_v49, %v1469_v2  ;;  %v911_v53 = vadd.f32 -5.0, %v895_v50 }
 0x2e1   : > { %942 = vst [vmem:[%s1437_s14 + $0x60] sm:$0xff] %v926_v46  ;;  %v929_v54 = vsel %vm1427_vm4, %v913_v52, %v842_v7 }
 0x2e2   : > { %945 = vst [vmem:[%s1437_s14 + $0x78] sm:$0xff] %v929_v54  ;;  %v927_v55 = vsel %vm1427_vm4, %v911_v53, %v834_v11 }
 0x2e3   : > { %943 = vst [vmem:[%s1437_s14 + $0x68] sm:$0xff] %v927_v55 }
 0x2e4 PF: > { %s17_s24 = sadd.s32 1, %s1285_s24  }
 0x2e5   : > { %p14_p4 = scmp.ge.s32.totalorder %s17_s24, 4  }
 0x2e7   :  { %16 = sbr.rel (!%p14_p4) target bundleno = 1 (0x1), region = 78 }

</bundles_post_ra>
